<compile_context>
chip_gen: v5e
topology: v5e:2x2
jax: 0.10.0
libtpu: 0.0.40
codegen_flags: <defaults>
</compile_context>

<pallas_src>
import math

import jax
import jax.numpy as jnp
from jax.experimental import pallas as pl
from jax.experimental.pallas import tpu as pltpu


_TARGET_BLOCK_BYTES = 4 * 1024 * 1024      # ~4 MiB output blocks (2x buffered = 8 MiB)
_VMEM_LIMIT_BYTES = 32 * 1024 * 1024       # safe on v5e/v6e (128 MiB) and v7x (64 MiB)


# ---------------------------------------------------------------------------
# Kernels
# ---------------------------------------------------------------------------
def _const_fill_kernel(lev_ref, vals_ref, out_ref):
    # lev_encoding=True: per-level constant fill.  `vals_ref` is the (L,) SMEM
    # table of per-level scalars; no tensor data is read from HBM at all.
    val = vals_ref[lev_ref[0] - 1]
    out_ref[...] = jnp.full(out_ref.shape, val, dtype=out_ref.dtype)


def _row_broadcast_kernel(lev_ref, row_ref, out_ref):
    # lev_encoding=False: broadcast the selected level's embedding row across
    # the sequence axis.  row_ref is the (1, 1, W) row picked by the
    # scalar-prefetch-driven index_map; its block index is constant across the
    # grid so it is fetched once and stays resident in VMEM.
    del lev_ref
    out_ref[...] = jnp.broadcast_to(row_ref[...], out_ref.shape).astype(out_ref.dtype)


# ---------------------------------------------------------------------------
# Shared pallas_call builder (tiled, pipelined, lane-dense-aware output)
# ---------------------------------------------------------------------------
def _row_tile(rows, width, itemsize):
    """Pick a row-block size: full array if small, else a multiple of 8 sized
    to roughly _TARGET_BLOCK_BYTES per block."""
    block_rows = max(8, (_TARGET_BLOCK_BYTES // max(1, width * itemsize)) // 8 * 8)
    if block_rows >= rows:
        return rows
    return block_rows


def _pallas_fill(kernel, operands, lev_arr, in_specs, rows, width, dtype):
    tile = _row_tile(rows, width, jnp.dtype(dtype).itemsize)
    return pl.pallas_call(
        kernel,
        out_shape=jax.ShapeDtypeStruct((1, rows, width), dtype),
        grid_spec=pltpu.PrefetchScalarGridSpec(
            num_scalar_prefetch=1,
            grid=(pl.cdiv(rows, tile),),
            in_specs=in_specs,
            out_specs=pl.BlockSpec((1, tile, width), lambda i, lev_ref: (0, i, 0)),
        ),
        compiler_params=pltpu.CompilerParams(
            dimension_semantics=("parallel",),
            vmem_limit_bytes=_VMEM_LIMIT_BYTES,
        ),
    )(lev_arr, *operands)


# ---------------------------------------------------------------------------
# Wrappers (forward semantics of LevelEncoding_de)
# ---------------------------------------------------------------------------
def level_encoding_de_true(x, lev, enc_le):
    """lev_encoding=True branch.  enc_le: (L, max_len, H) float32, constant per
    level as constructed by the module's __init__ (requires_grad=False)."""
    _, S, H = x.shape
    L, max_len, hidden = enc_le.shape
    assert hidden == H and S <= max_len
    # Each level's (max_len, H) slice is a single scalar -> collapse to (L,)
    # and keep it in SMEM; the kernel becomes write-only.
    lev_vals = enc_le.reshape(L, -1)[:, 0]                        # (L,) float32
    lev_arr = jnp.clip(jnp.asarray([lev], dtype=jnp.int32), 1, L)  # clamp: no OOB index

    if (S * H) % 128 == 0:           # lane-dense output slab (unmasked stores)
        rows, width = (S * H) // 128, 128
    else:                            # fallback: (S, H) tiles (H is the full lane dim)
        rows, width = S, H

    out = _pallas_fill(
        _const_fill_kernel,
        operands=(lev_vals,),
        lev_arr=lev_arr,
        in_specs=[pl.BlockSpec(memory_space=pltpu.MemorySpace.SMEM)],
        rows=rows,
        width=width,
        dtype=enc_le.dtype,
    )
    return out.reshape(1, S, H)


def level_encoding_de_false(x, lev, emb_table):
    """lev_encoding=False branch.  emb_table: (L, H) float32 (nn.Embedding weight)."""
    _, S, H = x.shape
    L, hidden = emb_table.shape
    assert hidden == H
    lev_arr = jnp.clip(jnp.asarray([lev], dtype=jnp.int32), 1, L)  # clamp: no OOB index

    if H % 128 != 0 and 128 % H == 0 and (S * H) % 128 == 0:
        # H divides 128: repack the tiny (L, H) table once into lane-dense
        # (L, 1, 128) rows so the output is an unmasked (rows, 128) slab.
        rep = 128 // H
        row_src = jnp.tile(emb_table[:, None, :], (1, 1, rep))    # (L, 1, 128)
        rows, width = (S * H) // 128, 128
    else:
        row_src = emb_table[:, None, :]                            # (L, 1, H)
        rows, width = S, H

    in_spec = pl.BlockSpec((1, 1, width), lambda i, lev_ref: (lev_ref[0] - 1, 0, 0))
    out = _pallas_fill(
        _row_broadcast_kernel,
        operands=(row_src,),
        lev_arr=lev_arr,
        in_specs=[in_spec],
        rows=rows,
        width=width,
        dtype=emb_table.dtype,
    )
    return out.reshape(1, S, H)


# ---------------------------------------------------------------------------
# Deterministic parameter construction (mirrors __init__)
# ---------------------------------------------------------------------------
def make_enc_le(enc_num_layers, max_len, hidden_dim):
    # For level j (1-indexed): every entry = -cos(2*pi*j/L) / sqrt(L)
    vals = jnp.array(
        [
            -math.cos(2.0 * math.pi * j / enc_num_layers) / math.sqrt(enc_num_layers)
            for j in range(1, enc_num_layers + 1)
        ],
        dtype=jnp.float32,
    )
    return jnp.broadcast_to(
        vals[:, None, None], (enc_num_layers, max_len, hidden_dim)
    ).astype(jnp.float32)


def make_emb_table(key, enc_num_layers, hidden_dim):
    # nn.Embedding default init ~ N(0, 1); deterministic via PRNGKey.
    return jax.random.normal(key, (enc_num_layers, hidden_dim), dtype=jnp.float32)


# ---------------------------------------------------------------------------
if __name__ == "__main__":
    # Small shapes consistent with the module.
    max_len = 16
    hidden_dim = 32
    enc_num_layers = 4
    B, S = 2, 8
    lev = 3  # 1-indexed level, as the PyTorch forward expects (lev - 1)

    key = jax.random.PRNGKey(0)
    kx, kemb = jax.random.split(key)
    x = jax.random.normal(kx, (B, S, hidden_dim), dtype=jnp.float32)

    # --- lev_encoding = True branch ---
    enc_le = make_enc_le(enc_num_layers, max_len, hidden_dim)
    out_true = level_encoding_de_true(x, lev, enc_le)
    jax.block_until_ready(out_true)
    ref_true = enc_le[lev - 1][None, :S, :]
    assert out_true.shape == (1, S, hidden_dim)
    assert jnp.allclose(out_true, ref_true), "lev_encoding=True mismatch"

    # --- lev_encoding = False branch ---
    emb_table = make_emb_table(kemb, enc_num_layers, hidden_dim)
    out_false = level_encoding_de_false(x, lev, emb_table)
    jax.block_until_ready(out_false)
    ref_false = jnp.broadcast_to(emb_table[lev - 1], (1, S, hidden_dim))
    assert out_false.shape == (1, S, hidden_dim)
    assert jnp.allclose(out_false, ref_false), "lev_encoding=False mismatch"

    print("KERNEL_OK")
</pallas_src>

<mosaic_0001>
module attributes {stable_mosaic.version = 11 : i64} {
  func.func @_const_fill_kernel(%arg0: i32, %arg1: memref<1xi32, #tpu.memory_space<smem>>, %arg2: memref<4xf32, #tpu.memory_space<smem>>, %arg3: memref<1x2x128xf32, #tpu.memory_space<vmem>>) attributes {dimension_semantics = [#tpu.dimension_semantics<parallel>], iteration_bounds = array<i64: 1>, scalar_prefetch = 1 : i64, scratch_operands = 0 : i64, tpu.core_type = #tpu.core_type<tc>, window_params = [{transform_indices = @transform_0, window_bounds = array<i64: 4>}, {transform_indices = @transform_1, window_bounds = array<i64: 1, 2, 128>}]} {
    %c0 = arith.constant 0 : index
    %0 = memref.load %arg1[%c0] : memref<1xi32, #tpu.memory_space<smem>>
    %c1_i32 = arith.constant 1 : i32
    %1 = arith.subi %0, %c1_i32 : i32
    %2 = arith.index_cast %1 : i32 to index
    %3 = memref.load %arg2[%2] : memref<4xf32, #tpu.memory_space<smem>>
    %4 = vector.broadcast %3 : f32 to vector<1x2x128xf32>
    %c0_0 = arith.constant 0 : index
    %c0_1 = arith.constant 0 : index
    %c0_2 = arith.constant 0 : index
    %5 = vector.load %arg3[%c0_0, %c0_1, %c0_2] : memref<1x2x128xf32, #tpu.memory_space<vmem>>, vector<1x2x128xf32>
    tpu.vector_store %arg3[%c0_0, %c0_1, %c0_2], %4 {strides = array<i32>} : memref<1x2x128xf32, #tpu.memory_space<vmem>>, vector<1x2x128xf32>,
    return
  }
  func.func @transform_0(%arg0: i32, %arg1: memref<1xi32, #tpu.memory_space<smem>>) -> i32 {
    %c0_i32 = arith.constant 0 : i32
    %c0_i32_0 = arith.constant 0 : i32
    return %c0_i32 : i32
  }
  func.func @transform_1(%arg0: i32, %arg1: memref<1xi32, #tpu.memory_space<smem>>) -> (i32, i32, i32) {
    %c0_i32 = arith.constant 0 : i32
    %c0_i32_0 = arith.constant 0 : i32
    %c0_i32_1 = arith.constant 0 : i32
    return %c0_i32, %arg0, %c0_i32_0 : i32, i32, i32
  }
}

</mosaic_0001>

<bundles_post_ra>
// kernel: tpu_custom_call.1
= control target key start
LH: loop header
LB: loop body
LE: loop exit
PB: predicated region body
PF: predicated region fallthrough
CT: control target
= control target key end

     0   :  { %8 = vsyncpa [#allocation6], 0  ;;  %s115_s0 = inlined_call_operand.<no memory space> [shape: s32[1], index: 0, kind: input, shape index: {}]   ;;  %s116_s1 = inlined_call_operand.vmem [shape: f32[4], index: 1, kind: input, shape index: {}]   ;;  %s117_s2 = inlined_call_operand.hbm [shape: f32[1,2,128], index: 2, kind: output, shape index: {}]  }
   0x1   :  { %9 = vsyncpa [#allocation5], 0  ;;  %s15_s11 = sshll.u32 %s116_s1, 4  ;;  %s89_s12 = smov [#allocation4]   ;;  %s16_s11 = int_to_ptr.vmem [resolvable:$true] %s15_s11 }
   0x2   :  { %18 = dma.vmem_to_smem %s16_s11, 16, %s89_s12, [#allocation6]  }
   0x3   :  { %85 = dma.done.wait [#allocation6], 16  }
   0x4   :  { %86 = vsyncadd [#allocation6], 4294967280 }
   0x5   :  { %23 = sfence }
   0x6   :  { %s46_s15 = sadd.s32 4294967295, %s115_s0  ;;  %s90_s17 = smov [#allocation7]  }
   0x7   :  { %s26_s16 = sld [smem:[#allocation4 + %s46_s15]]  ;;  %s34_s18 = sshll.u32 %s90_s17, 4  ;;  %s35_s18 = int_to_ptr.vmem [resolvable:$true] %s34_s18 }
   0x8   :  { %s36_s21 = sshll.u32 %s117_s2, 4  ;;  %s37_s21 = int_to_ptr.hbm [resolvable:$true] %s36_s21 }
   0xd   :  { %v27_v0 = vstv %s26_s16 }
   0xe   :  { %28 = vst [vmem:[#allocation7] sm:$0x3] %v27_v0 }
   0xf   :  { %39 = dma.vmem_to_hbm [thread:$0]  %s35_s18, 32, %s37_s21, [#allocation5]  }
  0x10   :  { %87 = dma.done.wait [#allocation5], 32  }
  0x11   :  { %88 = vsyncadd [#allocation5], 4294967264 }
  0x12   :  { %44 = vsyncpa [#allocation5], 1 }
  0x13   :  { %45 = vsyncpa [#allocation6], 1 }

</bundles_post_ra>
